<compile_context>
chip_gen: v7x
topology: tpu7x:2x2x1
jax: 0.10.0
libtpu: 0.0.40
codegen_flags: <defaults>
</compile_context>

<pallas_src>
import functools

import jax
import jax.numpy as jnp
from jax.experimental import pallas as pl
from jax.experimental.pallas import tpu as pltpu


def _round_up(x, m):
    return (x + m - 1) // m * m


def _cdiv(a, b):
    return (a + b - 1) // b


_F32 = 4  # bytes per element (kernel computes in float32)
_VMEM_BUDGET = 24 * 1024 * 1024   # working-set target; fits the raised scoped limit
_VMEM_LIMIT = 32 * 1024 * 1024    # <= physical VMEM on v5e/v6e (128 MiB) and v7x (64 MiB)


def _sigmoid(z):
    # Stable sigmoid via tanh: one EUP transcendental, no overflow for large |z|.
    return 0.5 * (jnp.tanh(0.5 * z) + 1.0)


def _lr_kernel_single(x_ref, w_ref, b_ref, o_ref):
    """Default path: full-D x tile, resident weight, one grid step per output tile."""
    z = jnp.dot(x_ref[...], w_ref[...], preferred_element_type=jnp.float32)
    o_ref[...] = _sigmoid(z + b_ref[...]).astype(o_ref.dtype)


def _make_ktiled_kernel(TK, w_resident):
    """Fallback path (very large D): K-tiled reduction accumulating into o_ref (f32)."""

    def kernel(x_ref, w_ref, b_ref, o_ref):
        k = pl.program_id(1)

        @pl.when(k == 0)
        def _init():
            o_ref[...] = jnp.zeros_like(o_ref)

        if w_resident:
            # Weight lives fully in VMEM (loaded once); slice the current K tile.
            w_tile = w_ref[pl.ds(pl.multiple_of(k * TK, 128), TK), :]
        else:
            w_tile = w_ref[...]

        o_ref[...] += jnp.dot(x_ref[...], w_tile, preferred_element_type=jnp.float32)

        @pl.when(k == pl.num_programs(1) - 1)
        def _finalize():
            o_ref[...] = _sigmoid(o_ref[...] + b_ref[...])

    return kernel


def _batch_tile(B, cap):
    """Balanced, sublane-aligned batch tile; >=2 tiles when B allows (v7x megacore)."""
    cap = max(8, cap // 8 * 8)
    n = _cdiv(B, cap)
    if n == 1 and B > 8:
        n = 2  # keep both v7x TensorCores busy; harmless no-op on 1-TC chips
    return _round_up(_cdiv(B, n), 8)


def _compiler_params(sem):
    return pltpu.CompilerParams(
        dimension_semantics=sem,
        allow_input_fusion=[True, True, True],  # let pads/casts fuse into the call
        vmem_limit_bytes=_VMEM_LIMIT,
    )


@functools.partial(jax.jit, static_argnames=("tb", "tk"))
def lr_forward(x, w, b, *, tb=512, tk=1024):
    """sigmoid(x @ w + b) via a Pallas TPU kernel.

    x: (B, D) float32
    w: (D, O) float32   (transposed vs torch.nn.Linear's (O, D) weight)
    b: (O,) or (1, O) float32
    returns: (B, O) float32
    """
    B, D = x.shape
    O = w.shape[1]

    xf = x.astype(jnp.float32)
    wf = w.astype(jnp.float32)
    bf = jnp.asarray(b, dtype=jnp.float32).reshape(1, O)

    O_pad = _round_up(O, 128)          # lane-dense output -> unmasked stores
    o_cols_pad = O_pad - O

    # ---------------- Default path: resident weight, single pass over K ----------
    w_bytes = D * O_pad * _F32
    per_row = 2 * (D + O_pad) * _F32   # double-buffered x row + out row
    if w_bytes + 8 * per_row <= _VMEM_BUDGET:
        TB = _batch_tile(B, min(tb, (_VMEM_BUDGET - w_bytes) // per_row))
        B_pad = _round_up(B, TB)

        x_p = xf if B_pad == B else jnp.pad(xf, ((0, B_pad - B), (0, 0)))
        w_p = wf if o_cols_pad == 0 else jnp.pad(wf, ((0, 0), (0, o_cols_pad)))
        b_p = bf if o_cols_pad == 0 else jnp.pad(bf, ((0, 0), (0, o_cols_pad)))

        out_p = pl.pallas_call(
            _lr_kernel_single,
            out_shape=jax.ShapeDtypeStruct((B_pad, O_pad), jnp.float32),
            grid=(B_pad // TB,),
            in_specs=[
                pl.BlockSpec((TB, D), lambda i: (i, 0)),      # x: streamed per batch tile
                pl.BlockSpec((D, O_pad), lambda i: (0, 0)),   # w: DMA'd once, stays resident
                pl.BlockSpec((1, O_pad), lambda i: (0, 0)),   # bias: resident
            ],
            out_specs=pl.BlockSpec((TB, O_pad), lambda i: (i, 0)),
            compiler_params=_compiler_params(("parallel",)),
        )(x_p, w_p, b_p)
        return out_p[:B, :O]

    # ---------------- Fallback path: K-tiled reduction (very large D) ------------
    # Cap TK so (streamed-w + minimal x/out tiles) fits the budget.
    tk_cap = max(128, (_VMEM_BUDGET - 2 * 8 * O_pad * _F32)
                 // ((2 * 8 + 2 * O_pad) * _F32) // 128 * 128)
    TK = min(_round_up(tk, 128), _round_up(D, 128), tk_cap)
    n_k = _cdiv(D, TK)
    TK = _round_up(_cdiv(D, n_k), 128)   # balance K tiles (avoid near-2x padding)
    D_pad = n_k * TK

    w_resident = D_pad * O_pad * _F32 <= _VMEM_BUDGET // 2
    w_fp = D_pad * O_pad * _F32 if w_resident else 2 * TK * O_pad * _F32
    per_row2 = 2 * (TK + O_pad) * _F32
    TB = _batch_tile(B, min(tb, max(8, (_VMEM_BUDGET - w_fp) // per_row2)))
    B_pad = _round_up(B, TB)

    x_p = jnp.pad(xf, ((0, B_pad - B), (0, D_pad - D)))
    w_p = jnp.pad(wf, ((0, D_pad - D), (0, o_cols_pad)))
    b_p = bf if o_cols_pad == 0 else jnp.pad(bf, ((0, 0), (0, o_cols_pad)))

    if w_resident:
        w_spec = pl.BlockSpec((D_pad, O_pad), lambda i, k: (0, 0))  # loaded once
    else:
        # TODO(synk): for very large D *and* O, add an output (N) grid axis instead
        # of streaming (TK, O_pad) weight tiles per batch tile.
        w_spec = pl.BlockSpec((TK, O_pad), lambda i, k: (k, 0))

    out_p = pl.pallas_call(
        _make_ktiled_kernel(TK, w_resident),
        out_shape=jax.ShapeDtypeStruct((B_pad, O_pad), jnp.float32),
        grid=(B_pad // TB, D_pad // TK),
        in_specs=[
            pl.BlockSpec((TB, TK), lambda i, k: (i, k)),
            w_spec,
            pl.BlockSpec((1, O_pad), lambda i, k: (0, 0)),
        ],
        out_specs=pl.BlockSpec((TB, O_pad), lambda i, k: (i, 0)),
        compiler_params=_compiler_params(("parallel", "arbitrary")),
    )(x_p, w_p, b_p)
    return out_p[:B, :O]


if __name__ == "__main__":
    # Small shapes consistent with the module: batch=8, input_dim=32, output_dim=2.
    batch, input_dim, output_dim = 8, 32, 2

    key = jax.random.PRNGKey(0)
    kx, kw, kb = jax.random.split(key, 3)

    # Deterministic init mimicking torch.nn.Linear's uniform(-1/sqrt(in), 1/sqrt(in)).
    bound = 1.0 / (input_dim ** 0.5)
    x = jax.random.normal(kx, (batch, input_dim), dtype=jnp.float32)
    w = jax.random.uniform(kw, (input_dim, output_dim), dtype=jnp.float32,
                           minval=-bound, maxval=bound)
    b = jax.random.uniform(kb, (output_dim,), dtype=jnp.float32,
                           minval=-bound, maxval=bound)

    out = lr_forward(x, w, b)
    jax.block_until_ready(out)

    ref = jax.nn.sigmoid(x @ w + b)
    assert out.shape == (batch, output_dim)
    max_err = float(jnp.max(jnp.abs(out - ref)))
    assert jnp.allclose(out, ref, atol=1e-3, rtol=1e-3), max_err

    print("KERNEL_OK")
</pallas_src>

<mosaic_0001>
module attributes {stable_mosaic.version = 11 : i64} {
  func.func @_lr_kernel_single(%arg0: i32, %arg1: memref<8x32xf32, #tpu.memory_space<vmem>>, %arg2: memref<32x128xf32, #tpu.memory_space<vmem>>, %arg3: memref<1x128xf32, #tpu.memory_space<vmem>>, %arg4: memref<8x128xf32, #tpu.memory_space<vmem>>) attributes {dimension_semantics = [#tpu.dimension_semantics<parallel>], iteration_bounds = array<i64: 1>, scalar_prefetch = 0 : i64, scratch_operands = 0 : i64, tpu.core_type = #tpu.core_type<tc>, window_params = [{transform_indices = @transform_0, window_bounds = array<i64: 8, 32>}, {pipeline_mode = #tpu.pipeline_mode<synchronous>, transform_indices = @transform_1, window_bounds = array<i64: 32, 128>}, {pipeline_mode = #tpu.pipeline_mode<synchronous>, transform_indices = @transform_2, window_bounds = array<i64: 1, 128>}, {transform_indices = @transform_3, window_bounds = array<i64: 8, 128>}]} {
    %c0 = arith.constant 0 : index
    %c0_0 = arith.constant 0 : index
    %0 = vector.load %arg1[%c0, %c0_0] : memref<8x32xf32, #tpu.memory_space<vmem>>, vector<8x32xf32>
    %c0_1 = arith.constant 0 : index
    %c0_2 = arith.constant 0 : index
    %1 = vector.load %arg2[%c0_1, %c0_2] : memref<32x128xf32, #tpu.memory_space<vmem>>, vector<32x128xf32>
    %cst = arith.constant dense<0.000000e+00> : vector<8x128xf32>
    %2 = tpu.matmul %0, %1, %cst {dimension_numbers = #tpu.dot_dimension_numbers<[1], [0], [0], [1], [0, 0, 1, 1], [], []>} : vector<8x32xf32>, vector<32x128xf32>, vector<8x128xf32> -> vector<8x128xf32>
    %c0_3 = arith.constant 0 : index
    %c0_4 = arith.constant 0 : index
    %3 = vector.load %arg3[%c0_3, %c0_4] : memref<1x128xf32, #tpu.memory_space<vmem>>, vector<1x128xf32>
    %4 = vector.broadcast %3 : vector<1x128xf32> to vector<8x128xf32>
    %5 = arith.addf %2, %4 : vector<8x128xf32>
    %cst_5 = arith.constant 5.000000e-01 : f32
    %6 = vector.broadcast %cst_5 : f32 to vector<8x128xf32>
    %7 = arith.mulf %6, %5 : vector<8x128xf32>
    %8 = math.tanh %7 : vector<8x128xf32>
    %cst_6 = arith.constant 1.000000e+00 : f32
    %9 = vector.broadcast %cst_6 : f32 to vector<8x128xf32>
    %10 = arith.addf %8, %9 : vector<8x128xf32>
    %cst_7 = arith.constant 5.000000e-01 : f32
    %11 = vector.broadcast %cst_7 : f32 to vector<8x128xf32>
    %12 = arith.mulf %11, %10 : vector<8x128xf32>
    %c0_8 = arith.constant 0 : index
    %c0_9 = arith.constant 0 : index
    %13 = vector.load %arg4[%c0_8, %c0_9] : memref<8x128xf32, #tpu.memory_space<vmem>>, vector<8x128xf32>
    tpu.vector_store %arg4[%c0_8, %c0_9], %12 {strides = array<i32>} : memref<8x128xf32, #tpu.memory_space<vmem>>, vector<8x128xf32>,
    return
  }
  func.func @transform_0(%arg0: i32) -> (i32, i32) {
    %c0_i32 = arith.constant 0 : i32
    %c0_i32_0 = arith.constant 0 : i32
    return %arg0, %c0_i32 : i32, i32
  }
  func.func @transform_1(%arg0: i32) -> (i32, i32) {
    %c0_i32 = arith.constant 0 : i32
    %c0_i32_0 = arith.constant 0 : i32
    %c0_i32_1 = arith.constant 0 : i32
    return %c0_i32, %c0_i32_0 : i32, i32
  }
  func.func @transform_2(%arg0: i32) -> (i32, i32) {
    %c0_i32 = arith.constant 0 : i32
    %c0_i32_0 = arith.constant 0 : i32
    %c0_i32_1 = arith.constant 0 : i32
    return %c0_i32, %c0_i32_0 : i32, i32
  }
  func.func @transform_3(%arg0: i32) -> (i32, i32) {
    %c0_i32 = arith.constant 0 : i32
    %c0_i32_0 = arith.constant 0 : i32
    return %arg0, %c0_i32 : i32, i32
  }
}

</mosaic_0001>

<bundles_post_ra>
// kernel: lr_forward.2
= control target key start
LH: loop header
LB: loop body
LE: loop exit
PB: predicated region body
PF: predicated region fallthrough
CT: control target
= control target key end

     0   :  { %s247_s0 = inlined_call_operand.vmem [shape: f32[8,32], index: 0, kind: input, shape index: {}]   ;;  %s248_s1 = inlined_call_operand.vmem [shape: f32[32,2], index: 1, kind: input, shape index: {}]   ;;  %s249_s2 = inlined_call_operand.<no memory space> [shape: f32[], index: 2, kind: input, shape index: {}]   ;;  %s250_s3 = inlined_call_operand.vmem [shape: f32[1,2], index: 3, kind: input, shape index: {}]   ;;  %s251_s4 = inlined_call_operand.vmem [shape: f32[8,128], index: 4, kind: output, shape index: {}]  }
   0x1   :  { %v9_v0 = vstv %s249_s2 }
   0x2   :  { %v18_v1 = vlaneseq  ;;  %v195_v2 = vmov 0.0|0.0   ;;  %v17_v3 = vld [vmem:[%s248_s1] sm:$0xff]  ;;  %v163_v5 = vld [vmem:[%s248_s1 + $0x8] sm:$0xff]  ;;  %v164_v8 = vld [vmem:[%s248_s1 + $0x10] sm:$0xff]  ;;  %vm196_vm0 = vmmov 0   ;;  %v197_v9 = vmov 0.0  }
   0x3   :  { %184 = vmatprep.subr.bf16.mxu0 %v195_v2  ;;  %v55_v6 = vld [vmem:[%s250_s3] sm:$0x1]  ;;  %181 = vmatprep.mubr.msk.f32.mxu0 %vm196_vm0, %v197_v9  ;;  %v165_v10 = vld [vmem:[%s248_s1 + $0x18] sm:$0xff]  ;;  %vm80_vm3 = vcmask 261120  }
   0x4   :  { %v19_v4 = vand.u32 127, %v18_v1  ;;  %v57_v7 = vshrl.u32 %v18_v1, 7  ;;  %v68_v19 = vld [vmem:[%s247_s0] sm:$0xff] }
   0x6   :  { %vm21_vm1 = vcmp.lt.s32.totalorder %v19_v4, 2  ;;  %vm59_vm2 = vcmp.lt.s32.totalorder %v57_v7, 1 }
   0x7   :  { %v22_v11 = vsel %vm21_vm1, %v17_v3, %v9_v0  ;;  %v31_v12 = vsel %vm21_vm1, %v163_v5, %v9_v0  ;;  %v60_v13 = vsel %vm59_vm2, %v55_v6, %v9_v0  ;;  %v41_v14 = vsel %vm21_vm1, %v164_v8, %v9_v0 }
   0x8   :  { %v65_v15 = vsel %vm21_vm1, %v60_v13, %v9_v0  ;;  %v185_v16 = vpack.c.bf16 %v31_v12, %v22_v11  ;;  %v51_v17 = vsel %vm21_vm1, %v165_v10, %v9_v0 }
   0x9   :  { %67 = vst [vmem:[#allocation13] sm:$0x1] %v65_v15  ;;  %v188_v18 = vpack.c.bf16 %v51_v17, %v41_v14 }
   0xa   :  { %186 = vmatpush3.bf16.msra.mxu0 %v185_v16 }
   0xb   :  { %187 = vmatprep.subr.bf16.mxu0 %v195_v2 }
   0xe   :  { %189 = vmatpush3.bf16.msra.mxu0 %v188_v18 }
  0x10   :  { %v166_v20 = vld [vmem:[#allocation13] ss:$0 sm:$0xff] }
  0x11   :  { %182 = vmatmul.mubr.msk.f32.vlgmr.msra.gmra.mrb[0].mxu0 %vm80_vm3, %v68_v19 }
  0xe4   :  { %v150_v21 = vpop.f32.mrb[0].mxu0 }
  0xe5   :  { %v151_v22 = vadd.f32 %v166_v20, %v150_v21  ;;  %v183_v23 = vpop.f32.mrb[1].mxu0 }
  0xe7   :  { %v154_v24 = vmul.f32 0.5, %v151_v22 }
  0xe9   :  { %193 = vtanh.f32 %v154_v24 }
  0xf3   :  { %v194_v25 = vpop.eup %193 }
  0xf4   :  { %v156_v26 = vadd.f32 1.0, %v194_v25 }
  0xf6   :  { %v157_v27 = vmul.f32 0.5, %v156_v26 }
  0xf8   :  { %158 = vst [vmem:[%s251_s4] sm:$0xff] %v157_v27 }

</bundles_post_ra>
